<compile_context>
chip_gen: v7x
topology: tpu7x:2x2x1
jax: 0.10.0
libtpu: 0.0.40
codegen_flags: <defaults>
</compile_context>

<pallas_src>
import functools

import jax
import jax.numpy as jnp
from jax.experimental import pallas as pl
from jax.experimental.pallas import tpu as pltpu

_LANE = 128
_SUB = 8
_MAX_ROW_BLOCK = 2048   # (2048, 128) f32 = 1 MiB per input per pipeline buffer
_ROW_ALIGN = 32         # row-block multiple that satisfies f32/bf16/int8 tiling


def _round_up(x, m):
    return ((x + m - 1) // m) * m


def _tensorcores_per_chip():
    """Best-effort TensorCores-per-chip detection (v7x: 2, v5e/v6e: 1)."""
    try:
        kind = jax.devices()[0].device_kind.lower()
    except Exception:
        return 1
    return 2 if ("v7" in kind or "tpu7" in kind) else 1


def _wbce_kernel(z_ref, t_ref, w_ref, loss_ref, wsum_ref, *,
                 rows, row_block, steps_per_split, need_mask):
    c = pl.program_id(0)   # TensorCore-split axis
    i = pl.program_id(1)   # reduction axis ("arbitrary")

    # Zero the resident (1, 8, 128) accumulators at the start of each split.
    @pl.when(i == 0)
    def _():
        loss_ref[...] = jnp.zeros_like(loss_ref)
        wsum_ref[...] = jnp.zeros_like(wsum_ref)

    z = z_ref[...].astype(jnp.float32)
    t = t_ref[...].astype(jnp.float32)
    w = w_ref[...].astype(jnp.float32)

    # w*clamp(z,0) - w*z*t + w*log(1+exp(-|z|)), with the weight factored out
    # (1 mul/elem instead of 3) and the numerically stable log1p form.
    elem = w * (jnp.maximum(z, 0.0) - z * t + jnp.log1p(jnp.exp(-jnp.abs(z))))

    def accumulate(e, wv):
        # Fold the row-block axis into (8, 128) partials with pure VPU adds
        # (sublane-tile-aligned reshape -> free); no per-step XLU reduce.
        loss_ref[...] += jnp.sum(e.reshape(-1, _SUB, _LANE), axis=0)[None]
        wsum_ref[...] += jnp.sum(wv.reshape(-1, _SUB, _LANE), axis=0)[None]

    if need_mask:  # static: only emitted when a partial/phantom block can exist
        # NOTE: block_start intentionally unclamped so phantom steps give a
        # negative (rows - block_start) and the whole tile masks to zero.
        block_start = (c * steps_per_split + i) * row_block
        is_edge = block_start + row_block > rows

        @pl.when(jnp.logical_not(is_edge))
        def _():
            accumulate(elem, w)          # interior blocks: no mask ops at all

        @pl.when(is_edge)
        def _():
            row_ids = jax.lax.broadcasted_iota(jnp.int32, (row_block, _LANE), 0)
            valid = row_ids < (rows - block_start)
            # Mask BOTH elem and w: garbage rows may be NaN/Inf and 0*NaN=NaN.
            accumulate(jnp.where(valid, elem, 0.0), jnp.where(valid, w, 0.0))
    else:
        accumulate(elem, w)


def weighted_bce_loss_2d(logits, labels, weights, *, num_splits=None):
    """Pallas implementation of WeightedBCELoss2d.forward. Returns a scalar."""
    assert logits.shape == labels.shape == weights.shape
    n = logits.size

    pad = (-n) % _LANE

    def to2d(x):
        x = x.reshape(-1)
        if pad:
            # PERF CLIFF (rare for NCHW segmentation shapes): a non-multiple-
            # of-128 element count forces a copying jnp.pad of each input
            # (extra HBM read+write per array) before the kernel runs.
            # Zero-padded weights contribute 0, so the result is unaffected.
            x = jnp.pad(x, (0, pad))
        return x.reshape(-1, _LANE)

    # Inputs are streamed in their native dtype (f32/bf16/int8); the kernel
    # upcasts to f32 internally, so narrower dtypes directly cut HBM traffic.
    z2, t2, w2 = to2d(logits), to2d(labels), to2d(weights)
    rows = z2.shape[0]

    row_block = min(_MAX_ROW_BLOCK, _round_up(rows, _ROW_ALIGN))
    nblocks = pl.cdiv(rows, row_block)

    if num_splits is None:
        num_splits = _tensorcores_per_chip()
    num_splits = max(1, min(num_splits, nblocks))

    steps_per_split = pl.cdiv(nblocks, num_splits)
    # Masking is only possible when there is a partial edge block or a phantom
    # block; with num_splits == 1 (v5e/v6e) there are never phantom blocks.
    need_mask = not (rows % row_block == 0 and nblocks % num_splits == 0)

    def in_map(c, i):
        # Clamp so phantom steps (beyond the real block count) re-read the last
        # block; their contribution is masked to zero inside the kernel.
        return (jnp.minimum(c * steps_per_split + i, nblocks - 1), 0)

    in_spec = pl.BlockSpec((row_block, _LANE), in_map)
    out_spec = pl.BlockSpec((1, _SUB, _LANE), lambda c, i: (c, 0, 0))

    if num_splits > 1:
        # v7x: make the 2-TensorCore split real — CORE_PARALLEL actually shards
        # the leading grid axis across cores (plain "parallel" does not).
        dim_sem = (pltpu.CORE_PARALLEL, pltpu.ARBITRARY)
    else:
        # Single-TC chips: the grid is a serial loop; everything "arbitrary".
        dim_sem = (pltpu.ARBITRARY, pltpu.ARBITRARY)

    kernel = functools.partial(
        _wbce_kernel,
        rows=rows,
        row_block=row_block,
        steps_per_split=steps_per_split,
        need_mask=need_mask,
    )

    in_bytes = sum(int(a.size) * a.dtype.itemsize for a in (z2, t2, w2))
    out_bytes = 2 * num_splits * _SUB * _LANE * 4
    cost = pl.CostEstimate(flops=6 * n, transcendentals=2 * n,
                           bytes_accessed=in_bytes + out_bytes)

    loss_parts, w_parts = pl.pallas_call(
        kernel,
        out_shape=(
            jax.ShapeDtypeStruct((num_splits, _SUB, _LANE), jnp.float32),
            jax.ShapeDtypeStruct((num_splits, _SUB, _LANE), jnp.float32),
        ),
        grid_spec=pltpu.PrefetchScalarGridSpec(
            num_scalar_prefetch=0,
            grid=(num_splits, steps_per_split),
            in_specs=[in_spec, in_spec, in_spec],
            out_specs=[out_spec, out_spec],
        ),
        compiler_params=pltpu.CompilerParams(dimension_semantics=dim_sem),
        cost_estimate=cost,
    )(z2, t2, w2)

    # Tiny cross-lane reductions + scalar divide stay in plain JAX.
    return jnp.sum(loss_parts) / (jnp.sum(w_parts) + 1e-12)


def _reference(logits, labels, weights):
    z = logits.reshape(-1).astype(jnp.float32)
    t = labels.reshape(-1).astype(jnp.float32)
    w = weights.reshape(-1).astype(jnp.float32)
    elem = (w * jnp.maximum(z, 0.0) - w * z * t
            + w * jnp.log(1.0 + jnp.exp(-jnp.abs(z))))
    return jnp.sum(elem) / (jnp.sum(w) + 1e-12)


if __name__ == "__main__":
    key = jax.random.PRNGKey(0)
    k1, k2, k3 = jax.random.split(key, 3)

    f = jax.jit(weighted_bce_loss_2d)

    # Main check: NCHW, small segmentation-style shapes (f32).
    N, C, H, W = 2, 3, 16, 16
    logits = jax.random.normal(k1, (N, C, H, W), dtype=jnp.float32)
    labels = (jax.random.uniform(k2, (N, C, H, W)) > 0.5).astype(jnp.float32)
    # positive per-pixel weights (e.g. 30*border + 3*contour + 1*interior style)
    weights = 1.0 + 29.0 * jax.random.uniform(k3, (N, C, H, W), dtype=jnp.float32)

    out = jax.block_until_ready(f(logits, labels, weights))
    ref = _reference(logits, labels, weights)
    assert jnp.allclose(out, ref, rtol=1e-5, atol=1e-5), (out, ref)

    # Second check: awkward shape exercising the lane-pad + masked-edge path.
    sh = (2, 1, 15, 13)
    k4, k5, k6 = jax.random.split(jax.random.PRNGKey(1), 3)
    lz = jax.random.normal(k4, sh, dtype=jnp.float32)
    lt = (jax.random.uniform(k5, sh) > 0.5).astype(jnp.float32)
    lw = 1.0 + 29.0 * jax.random.uniform(k6, sh, dtype=jnp.float32)
    out2 = jax.block_until_ready(f(lz, lt, lw))
    ref2 = _reference(lz, lt, lw)
    assert jnp.allclose(out2, ref2, rtol=1e-5, atol=1e-5), (out2, ref2)

    # Third check: narrow-dtype streaming path (bf16 logits/weights, int8
    # labels) — no wrapper upcast, cast to f32 happens inside the kernel.
    k7, k8, k9 = jax.random.split(jax.random.PRNGKey(2), 3)
    sh3 = (2, 4, 32, 32)
    bz = jax.random.normal(k7, sh3, dtype=jnp.bfloat16)
    bt = (jax.random.uniform(k8, sh3) > 0.5).astype(jnp.int8)
    bw = (1.0 + 29.0 * jax.random.uniform(k9, sh3)).astype(jnp.bfloat16)
    out3 = jax.block_until_ready(f(bz, bt, bw))
    ref3 = _reference(bz, bt, bw)
    assert jnp.allclose(out3, ref3, rtol=1e-4, atol=1e-4), (out3, ref3)

    print("KERNEL_OK")
</pallas_src>

<mosaic_0001>
module attributes {stable_mosaic.version = 11 : i64} {
  func.func @_wbce_kernel(%arg0: i32, %arg1: i32, %arg2: memref<32x128xf32, #tpu.memory_space<vmem>>, %arg3: memref<32x128xf32, #tpu.memory_space<vmem>>, %arg4: memref<32x128xf32, #tpu.memory_space<vmem>>, %arg5: memref<1x8x128xf32, #tpu.memory_space<vmem>>, %arg6: memref<1x8x128xf32, #tpu.memory_space<vmem>>) attributes {dimension_semantics = [#tpu.dimension_semantics<arbitrary>, #tpu.dimension_semantics<arbitrary>], iteration_bounds = array<i64: 1, 1>, scalar_prefetch = 0 : i64, scratch_operands = 0 : i64, tpu.core_type = #tpu.core_type<tc>, window_params = [{transform_indices = @transform_0, window_bounds = array<i64: 32, 128>}, {transform_indices = @transform_1, window_bounds = array<i64: 32, 128>}, {transform_indices = @transform_2, window_bounds = array<i64: 32, 128>}, {transform_indices = @transform_3, window_bounds = array<i64: 1, 8, 128>}, {transform_indices = @transform_4, window_bounds = array<i64: 1, 8, 128>}]} {
    %c0_i32 = arith.constant 0 : i32
    %0 = arith.cmpi eq, %arg1, %c0_i32 : i32
    %1 = arith.extui %0 : i1 to i32
    %c0_i32_0 = arith.constant 0 : i32
    %2 = arith.cmpi ne, %1, %c0_i32_0 : i32
    scf.if %2 {
      %cst_10 = arith.constant 0.000000e+00 : f32
      %27 = vector.broadcast %cst_10 : f32 to vector<1x8x128xf32>
      %c0_11 = arith.constant 0 : index
      %c0_12 = arith.constant 0 : index
      %c0_13 = arith.constant 0 : index
      %28 = vector.load %arg5[%c0_11, %c0_12, %c0_13] : memref<1x8x128xf32, #tpu.memory_space<vmem>>, vector<1x8x128xf32>
      tpu.vector_store %arg5[%c0_11, %c0_12, %c0_13], %27 {strides = array<i32>} : memref<1x8x128xf32, #tpu.memory_space<vmem>>, vector<1x8x128xf32>,
      %cst_14 = arith.constant 0.000000e+00 : f32
      %29 = vector.broadcast %cst_14 : f32 to vector<1x8x128xf32>
      %c0_15 = arith.constant 0 : index
      %c0_16 = arith.constant 0 : index
      %c0_17 = arith.constant 0 : index
      %30 = vector.load %arg6[%c0_15, %c0_16, %c0_17] : memref<1x8x128xf32, #tpu.memory_space<vmem>>, vector<1x8x128xf32>
      tpu.vector_store %arg6[%c0_15, %c0_16, %c0_17], %29 {strides = array<i32>} : memref<1x8x128xf32, #tpu.memory_space<vmem>>, vector<1x8x128xf32>,
    } else {
    }
    %c0 = arith.constant 0 : index
    %c0_1 = arith.constant 0 : index
    %3 = vector.load %arg2[%c0, %c0_1] : memref<32x128xf32, #tpu.memory_space<vmem>>, vector<32x128xf32>
    %c0_2 = arith.constant 0 : index
    %c0_3 = arith.constant 0 : index
    %4 = vector.load %arg3[%c0_2, %c0_3] : memref<32x128xf32, #tpu.memory_space<vmem>>, vector<32x128xf32>
    %c0_4 = arith.constant 0 : index
    %c0_5 = arith.constant 0 : index
    %5 = vector.load %arg4[%c0_4, %c0_5] : memref<32x128xf32, #tpu.memory_space<vmem>>, vector<32x128xf32>
    %cst = arith.constant 0.000000e+00 : f32
    %6 = vector.broadcast %cst : f32 to vector<32x128xf32>
    %7 = arith.maximumf %3, %6 : vector<32x128xf32>
    %8 = arith.mulf %3, %4 : vector<32x128xf32>
    %9 = arith.subf %7, %8 : vector<32x128xf32>
    %10 = math.absf %3 : vector<32x128xf32>
    %cst_6 = arith.constant 0.000000e+00 : f32
    %11 = vector.broadcast %cst_6 : f32 to vector<32x128xf32>
    %12 = arith.subf %11, %10 : vector<32x128xf32>
    %13 = math.exp %12 : vector<32x128xf32>
    %14 = math.log1p %13 : vector<32x128xf32>
    %15 = arith.addf %9, %14 : vector<32x128xf32>
    %16 = arith.mulf %5, %15 : vector<32x128xf32>
    %c1_i32 = arith.constant 1 : i32
    %17 = arith.muli %arg0, %c1_i32 : i32
    %18 = arith.addi %17, %arg1 : i32
    %c32_i32 = arith.constant 32 : i32
    %19 = arith.muli %18, %c32_i32 : i32
    %c32_i32_7 = arith.constant 32 : i32
    %20 = arith.addi %19, %c32_i32_7 : i32
    %c12_i32 = arith.constant 12 : i32
    %21 = arith.cmpi sgt, %20, %c12_i32 : i32
    %true = arith.constant true
    %22 = arith.xori %21, %true : i1
    %23 = arith.extui %22 : i1 to i32
    %c0_i32_8 = arith.constant 0 : i32
    %24 = arith.cmpi ne, %23, %c0_i32_8 : i32
    scf.if %24 {
      %c0_10 = arith.constant 0 : index
      %c0_11 = arith.constant 0 : index
      %c0_12 = arith.constant 0 : index
      %27 = vector.load %arg5[%c0_10, %c0_11, %c0_12] : memref<1x8x128xf32, #tpu.memory_space<vmem>>, vector<1x8x128xf32>
      %28 = vector.shape_cast %16 : vector<32x128xf32> to vector<4x8x128xf32>
      %cst_13 = arith.constant dense<0.000000e+00> : vector<8x128xf32>
      %29 = vector.multi_reduction <add>, %28, %cst_13 [0] : vector<4x8x128xf32> to vector<8x128xf32>
      %30 = vector.shape_cast %29 : vector<8x128xf32> to vector<1x8x128xf32>
      %31 = arith.addf %27, %30 : vector<1x8x128xf32>
      %c0_14 = arith.constant 0 : index
      %c0_15 = arith.constant 0 : index
      %c0_16 = arith.constant 0 : index
      %32 = vector.load %arg5[%c0_14, %c0_15, %c0_16] : memref<1x8x128xf32, #tpu.memory_space<vmem>>, vector<1x8x128xf32>
      tpu.vector_store %arg5[%c0_14, %c0_15, %c0_16], %31 {strides = array<i32>} : memref<1x8x128xf32, #tpu.memory_space<vmem>>, vector<1x8x128xf32>,
      %c0_17 = arith.constant 0 : index
      %c0_18 = arith.constant 0 : index
      %c0_19 = arith.constant 0 : index
      %33 = vector.load %arg6[%c0_17, %c0_18, %c0_19] : memref<1x8x128xf32, #tpu.memory_space<vmem>>, vector<1x8x128xf32>
      %34 = vector.shape_cast %5 : vector<32x128xf32> to vector<4x8x128xf32>
      %cst_20 = arith.constant dense<0.000000e+00> : vector<8x128xf32>
      %35 = vector.multi_reduction <add>, %34, %cst_20 [0] : vector<4x8x128xf32> to vector<8x128xf32>
      %36 = vector.shape_cast %35 : vector<8x128xf32> to vector<1x8x128xf32>
      %37 = arith.addf %33, %36 : vector<1x8x128xf32>
      %c0_21 = arith.constant 0 : index
      %c0_22 = arith.constant 0 : index
      %c0_23 = arith.constant 0 : index
      %38 = vector.load %arg6[%c0_21, %c0_22, %c0_23] : memref<1x8x128xf32, #tpu.memory_space<vmem>>, vector<1x8x128xf32>
      tpu.vector_store %arg6[%c0_21, %c0_22, %c0_23], %37 {strides = array<i32>} : memref<1x8x128xf32, #tpu.memory_space<vmem>>, vector<1x8x128xf32>,
    } else {
    }
    %25 = arith.extui %21 : i1 to i32
    %c0_i32_9 = arith.constant 0 : i32
    %26 = arith.cmpi ne, %25, %c0_i32_9 : i32
    scf.if %26 {
      %27 = tpu.iota {dimensions = array<i32: 0>} : vector<32x128xi32>
      %c12_i32_10 = arith.constant 12 : i32
      %28 = arith.subi %c12_i32_10, %19 : i32
      %29 = vector.broadcast %28 : i32 to vector<32x128xi32>
      %30 = arith.cmpi slt, %27, %29 : vector<32x128xi32>
      %cst_11 = arith.constant 0.000000e+00 : f32
      %31 = vector.broadcast %cst_11 : f32 to vector<32x128xf32>
      %32 = arith.select %30, %16, %31 : vector<32x128xi1>, vector<32x128xf32>
      %cst_12 = arith.constant 0.000000e+00 : f32
      %33 = vector.broadcast %cst_12 : f32 to vector<32x128xf32>
      %34 = arith.select %30, %5, %33 : vector<32x128xi1>, vector<32x128xf32>
      %c0_13 = arith.constant 0 : index
      %c0_14 = arith.constant 0 : index
      %c0_15 = arith.constant 0 : index
      %35 = vector.load %arg5[%c0_13, %c0_14, %c0_15] : memref<1x8x128xf32, #tpu.memory_space<vmem>>, vector<1x8x128xf32>
      %36 = vector.shape_cast %32 : vector<32x128xf32> to vector<4x8x128xf32>
      %cst_16 = arith.constant dense<0.000000e+00> : vector<8x128xf32>
      %37 = vector.multi_reduction <add>, %36, %cst_16 [0] : vector<4x8x128xf32> to vector<8x128xf32>
      %38 = vector.shape_cast %37 : vector<8x128xf32> to vector<1x8x128xf32>
      %39 = arith.addf %35, %38 : vector<1x8x128xf32>
      %c0_17 = arith.constant 0 : index
      %c0_18 = arith.constant 0 : index
      %c0_19 = arith.constant 0 : index
      %40 = vector.load %arg5[%c0_17, %c0_18, %c0_19] : memref<1x8x128xf32, #tpu.memory_space<vmem>>, vector<1x8x128xf32>
      tpu.vector_store %arg5[%c0_17, %c0_18, %c0_19], %39 {strides = array<i32>} : memref<1x8x128xf32, #tpu.memory_space<vmem>>, vector<1x8x128xf32>,
      %c0_20 = arith.constant 0 : index
      %c0_21 = arith.constant 0 : index
      %c0_22 = arith.constant 0 : index
      %41 = vector.load %arg6[%c0_20, %c0_21, %c0_22] : memref<1x8x128xf32, #tpu.memory_space<vmem>>, vector<1x8x128xf32>
      %42 = vector.shape_cast %34 : vector<32x128xf32> to vector<4x8x128xf32>
      %cst_23 = arith.constant dense<0.000000e+00> : vector<8x128xf32>
      %43 = vector.multi_reduction <add>, %42, %cst_23 [0] : vector<4x8x128xf32> to vector<8x128xf32>
      %44 = vector.shape_cast %43 : vector<8x128xf32> to vector<1x8x128xf32>
      %45 = arith.addf %41, %44 : vector<1x8x128xf32>
      %c0_24 = arith.constant 0 : index
      %c0_25 = arith.constant 0 : index
      %c0_26 = arith.constant 0 : index
      %46 = vector.load %arg6[%c0_24, %c0_25, %c0_26] : memref<1x8x128xf32, #tpu.memory_space<vmem>>, vector<1x8x128xf32>
      tpu.vector_store %arg6[%c0_24, %c0_25, %c0_26], %45 {strides = array<i32>} : memref<1x8x128xf32, #tpu.memory_space<vmem>>, vector<1x8x128xf32>,
    } else {
    }
    return
  }
  func.func @transform_0(%arg0: i32, %arg1: i32) -> (i32, i32) {
    %c1_i32 = arith.constant 1 : i32
    %0 = arith.muli %arg0, %c1_i32 : i32
    %1 = arith.addi %0, %arg1 : i32
    %c0_i32 = arith.constant 0 : i32
    %2 = arith.minsi %1, %c0_i32 : i32
    %c0_i32_0 = arith.constant 0 : i32
    %c0_i32_1 = arith.constant 0 : i32
    return %2, %c0_i32_0 : i32, i32
  }
  func.func @transform_1(%arg0: i32, %arg1: i32) -> (i32, i32) {
    %c1_i32 = arith.constant 1 : i32
    %0 = arith.muli %arg0, %c1_i32 : i32
    %1 = arith.addi %0, %arg1 : i32
    %c0_i32 = arith.constant 0 : i32
    %2 = arith.minsi %1, %c0_i32 : i32
    %c0_i32_0 = arith.constant 0 : i32
    %c0_i32_1 = arith.constant 0 : i32
    return %2, %c0_i32_0 : i32, i32
  }
  func.func @transform_2(%arg0: i32, %arg1: i32) -> (i32, i32) {
    %c1_i32 = arith.constant 1 : i32
    %0 = arith.muli %arg0, %c1_i32 : i32
    %1 = arith.addi %0, %arg1 : i32
    %c0_i32 = arith.constant 0 : i32
    %2 = arith.minsi %1, %c0_i32 : i32
    %c0_i32_0 = arith.constant 0 : i32
    %c0_i32_1 = arith.constant 0 : i32
    return %2, %c0_i32_0 : i32, i32
  }
  func.func @transform_3(%arg0: i32, %arg1: i32) -> (i32, i32, i32) {
    %c0_i32 = arith.constant 0 : i32
    %c0_i32_0 = arith.constant 0 : i32
    %c0_i32_1 = arith.constant 0 : i32
    return %arg0, %c0_i32, %c0_i32_0 : i32, i32, i32
  }
  func.func @transform_4(%arg0: i32, %arg1: i32) -> (i32, i32, i32) {
    %c0_i32 = arith.constant 0 : i32
    %c0_i32_0 = arith.constant 0 : i32
    %c0_i32_1 = arith.constant 0 : i32
    return %arg0, %c0_i32, %c0_i32_0 : i32, i32, i32
  }
}

</mosaic_0001>

<bundles_post_ra>
// kernel: weighted_bce_loss_2d.1
= control target key start
LH: loop header
LB: loop body
LE: loop exit
PB: predicated region body
PF: predicated region fallthrough
CT: control target
= control target key end

     0   :  { %v255_v0 = vlaneseq  ;;  %s372_s0 = inlined_call_operand.vmem [shape: f32[12,128], index: 0, kind: input, shape index: {}]   ;;  %s373_s2 = inlined_call_operand.vmem [shape: f32[12,128], index: 2, kind: input, shape index: {}]   ;;  %s374_s4 = inlined_call_operand.vmem [shape: f32[1,8,128], index: 4, kind: output, shape index: {1}]   ;;  %s375_s1 = inlined_call_operand.vmem [shape: f32[12,128], index: 1, kind: input, shape index: {}]   ;;  %s376_s3 = inlined_call_operand.vmem [shape: f32[1,8,128], index: 3, kind: output, shape index: {0}]  }
   0x1   :  { %v148_v1 = vld [vmem:[%s372_s0] sm:$0xff]  ;;  %v149_v2 = vld [vmem:[%s372_s0 + $0x8] sm:$0xff] }
   0x2   :  { %v256_v3 = vshrl.u32 %v255_v0, 7  ;;  %v172_v4 = vand.u32 2147483647, %v148_v1  ;;  %v173_v5 = vand.u32 2147483647, %v149_v2  ;;  %v157_v9 = vld [vmem:[%s373_s2 + $0x8] sm:$0xff] }
   0x3   :  { %v156_v10 = vld [vmem:[%s373_s2] sm:$0xff]  ;;  %v153_v22 = vld [vmem:[%s375_s1 + $0x8] sm:$0xff]  ;;  %v160_v24 = vmax.f32 %v148_v1, 0.0  ;;  %v161_v28 = vmax.f32 %v149_v2, 0.0 }
   0x4   :  { %v257_v6 = vadd.s32 8, %v256_v3  ;;  %v176_v7 = vsub.f32 0.0, %v172_v4  ;;  %v177_v8 = vsub.f32 0.0, %v173_v5  ;;  %v152_v21 = vld [vmem:[%s375_s1] sm:$0xff]  ;;  %v165_v29 = vmul.f32 %v153_v22, %v149_v2 }
   0x5   :  { %v164_v25 = vmul.f32 %v152_v21, %v148_v1 }
   0x6   :  { %vm263_vm0 = vcmp.lt.s32.totalorder %v257_v6, 12  ;;  %v180_v11 = vmul.f32 1.442695, %v176_v7  ;;  %v182_v12 = vmul.f32 1.442695, %v177_v8  ;;  %v169_v36 = vsub.f32 %v161_v28, %v165_v29 }
   0x7   :  { %v271_v13 = vsel %vm263_vm0, %v157_v9, 0.0  ;;  %v168_v33 = vsub.f32 %v160_v24, %v164_v25 }
   0x8   :  { %v281_v14 = vadd.f32 %v271_v13, %v156_v10  ;;  %313 = vpow2.f32 %v180_v11 }
   0x9   :  { %315 = vpow2.f32 %v182_v12 }
   0xa   :  { %285 = vst [vmem:[%s374_s4] sm:$0xff] %v281_v14 }
  0x12   :  { %v314_v15 = vpop.eup %313 }
  0x13   :  { %v316_v16 = vpop.eup %315  ;;  %v188_v17 = vadd.f32 1.0, %v314_v15  ;;  %v191_v19 = vmul.f32 -0.5, %v314_v15  ;;  %v194_v26 = vand.u32 2147483647, %v314_v15 }
  0x14   :  { %v197_v18 = vadd.f32 1.0, %v316_v16  ;;  %v200_v20 = vmul.f32 -0.5, %v316_v16  ;;  %v203_v30 = vand.u32 2147483647, %v316_v16 }
  0x15   :  { %317 = vlog2.f32 %v188_v17  ;;  %v192_v23 = vadd.f32 1.0, %v191_v19  ;;  %vm195_vm1 = vcmp.lt.f32.partialorder %v194_v26, 0.0004427343 }
  0x16   :  { %319 = vlog2.f32 %v197_v18  ;;  %v201_v27 = vadd.f32 1.0, %v200_v20  ;;  %vm204_vm2 = vcmp.lt.f32.partialorder %v203_v30, 0.0004427343 }
  0x17   :  { %v193_v31 = vmul.f32 %v314_v15, %v192_v23 }
  0x18   :  { %v202_v34 = vmul.f32 %v316_v16, %v201_v27 }
  0x1f   :  { %v318_v32 = vpop.eup %317 }
  0x20   :  { %v320_v35 = vpop.eup %319  ;;  %v190_v37 = vmul.f32 0.6931472, %v318_v32 }
  0x21   :  { %v199_v38 = vmul.f32 0.6931472, %v320_v35 }
  0x22   :  { %v196_v39 = vsel %vm195_vm1, %v193_v31, %v190_v37 }
  0x23   :  { %v205_v40 = vsel %vm204_vm2, %v202_v34, %v199_v38  ;;  %v224_v41 = vadd.f32 %v196_v39, %v168_v33 }
  0x24   :  { %v225_v42 = vadd.f32 %v205_v40, %v169_v36 }
  0x25   :  { %v228_v43 = vmul.f32 %v224_v41, %v156_v10 }
  0x26   :  { %v229_v44 = vmul.f32 %v225_v42, %v157_v9 }
  0x28   :  { %v267_v45 = vsel %vm263_vm0, %v229_v44, 0.0 }
  0x29   :  { %v275_v46 = vadd.f32 %v267_v45, %v228_v43 }
  0x2b   :  { %279 = vst [vmem:[%s376_s3] sm:$0xff] %v275_v46 }

</bundles_post_ra>
